<compile_context>
chip_gen: v6e
topology: v6e:2x2x1
jax: 0.10.0
libtpu: 0.0.40
codegen_flags: <defaults>
</compile_context>

<pallas_src>
import jax
import jax.numpy as jnp
import numpy as np
from jax import lax
from jax.experimental import pallas as pl
from jax.experimental.pallas import tpu as pltpu

_EPS = 1e-5
_LANE = 128
# VMEM budget (bytes) for the pipelined tiles: 2 double-buffers x (in + out).
# ~4 MiB keeps the full working set (tiles + f32 temps) inside v5e's 16 MiB
# scoped default and far under v7x's 64 MiB physical VMEM.
_TILE_BUDGET_BYTES = 4 << 20
_VMEM_LIMIT_BYTES = 32 << 20


def _make_kernel(c_true, c_pad):
    """Build the per-tile kernel; c_true is the real channel count, c_pad the
    lane-dense (multiple-of-128) padded count the tiles actually carry."""
    need_mask = c_pad != c_true
    c_inv = 1.0 / float(c_true)

    def kernel(x_ref, w_ref, o_ref):
        # x_ref: (TR, C_pad) rows of the flattened (zero-padded) input
        # w_ref: (1, C_pad)  learned per-channel scale, kept in float32
        # o_ref: (TR, C_pad)
        x = x_ref[...].astype(jnp.float32)
        mu = jnp.sum(x, axis=-1, keepdims=True) * c_inv  # padded lanes are 0
        xc = x - mu
        if need_mask:
            lane = lax.broadcasted_iota(jnp.int32, x.shape, dimension=x.ndim - 1)
            xc = jnp.where(lane < c_true, xc, 0.0)       # keep pad out of var
        var = jnp.sum(xc * xc, axis=-1, keepdims=True) * c_inv
        inv_sigma = lax.rsqrt(var + _EPS)                # EUP rsqrt
        o_ref[...] = (x * inv_sigma * w_ref[...]).astype(o_ref.dtype)

    return kernel


def _sublane_multiple(itemsize):
    # Sub-32-bit dtypes pack rows along sublanes: bf16 -> 16, int8/fp8 -> 32.
    return {4: 8, 2: 16, 1: 32}.get(itemsize, 8)


def _pick_row_tile(rows, c_pad, itemsize, sublane):
    """Largest row tile (sublane-aligned) fitting the VMEM budget, while keeping
    >= 4 grid steps when the row count allows it (v7x has 2 TensorCores)."""
    per_row_bytes = 2 * c_pad * itemsize * 2            # dbl-buffered in + out
    cap = max(sublane, _TILE_BUDGET_BYTES // per_row_bytes)
    cap = (cap // sublane) * sublane
    # v7x: keep >= 4 grid steps (>= 2 per TensorCore) when rows are plentiful.
    quarter = -(-((rows + 3) // 4) // sublane) * sublane
    tr = min(cap, max(sublane, quarter))
    for t in (4096, 2048, 1024, 512, 256, 128, 64, 32, 16, 8):
        if t <= tr and t % sublane == 0:
            return t
    return max(sublane, tr)


def biasfree_layernorm_pallas(x, weight):
    """x: (..., C); weight: (C,). Returns array with the same shape/dtype as x."""
    orig_shape = x.shape
    C = orig_shape[-1]
    R = int(np.prod(orig_shape[:-1])) if len(orig_shape) > 1 else 1
    x2 = x.reshape(R, C)

    # Lane-dense channel padding (unmasked vst on the output is the biggest
    # single lever; Restormer-style C=48 would otherwise hit masked stores).
    C_pad = max(_LANE, -(-C // _LANE) * _LANE)

    itemsize = jnp.dtype(x.dtype).itemsize
    sublane = _sublane_multiple(itemsize)
    TR = _pick_row_tile(R, C_pad, itemsize, sublane)
    R_pad = -(-R // TR) * TR

    if (R_pad, C_pad) != (R, C):
        x2 = jnp.pad(x2, ((0, R_pad - R), (0, C_pad - C)))

    # Keep the scale in float32 (torch keeps the parameter fp32).
    w2 = weight.reshape(1, C).astype(jnp.float32)
    if C_pad != C:
        w2 = jnp.pad(w2, ((0, 0), (0, C_pad - C)))

    grid = (R_pad // TR,)
    kernel = _make_kernel(C, C_pad)

    out = pl.pallas_call(
        kernel,
        out_shape=jax.ShapeDtypeStruct((R_pad, C_pad), x.dtype),
        grid_spec=pltpu.PrefetchScalarGridSpec(
            num_scalar_prefetch=0,
            grid=grid,
            in_specs=[
                pl.BlockSpec((TR, C_pad), lambda i: (i, 0)),
                pl.BlockSpec((1, C_pad), lambda i: (0, 0)),
            ],
            out_specs=pl.BlockSpec((TR, C_pad), lambda i: (i, 0)),
        ),
        compiler_params=pltpu.CompilerParams(
            dimension_semantics=("parallel",),
            vmem_limit_bytes=_VMEM_LIMIT_BYTES,
        ),
    )(x2, w2)

    if (R_pad, C_pad) != (R, C):
        out = out[:R, :C]
    return out.reshape(orig_shape)


def biasfree_layernorm_ref(x, weight):
    """Pure-JAX reference matching torch semantics (unbiased=False variance)."""
    xf = x.astype(jnp.float32)
    mu = jnp.mean(xf, axis=-1, keepdims=True)
    var = jnp.mean((xf - mu) ** 2, axis=-1, keepdims=True)
    y = xf / jnp.sqrt(var + _EPS) * weight.astype(jnp.float32)
    return y.astype(x.dtype)


if __name__ == "__main__":
    key = jax.random.PRNGKey(0)
    k1, k2, k3, k4 = jax.random.split(key, 4)

    # Case 1: lane-dense channels (B=2, tokens=256, C=128), float32.
    B, S, C = 2, 256, 128
    x = jax.random.normal(k1, (B, S, C), jnp.float32)
    w = jnp.ones((C,), jnp.float32) + 0.1 * jax.random.normal(k2, (C,), jnp.float32)
    out = jax.block_until_ready(biasfree_layernorm_pallas(x, w))
    ref = jax.block_until_ready(biasfree_layernorm_ref(x, w))
    np.testing.assert_allclose(np.asarray(out), np.asarray(ref), rtol=1e-4, atol=1e-4)

    # Case 2: non-multiple-of-128 channels (Restormer-like C=48) -> padded/masked path.
    B2, H2, W2, C2 = 2, 16, 16, 48
    x2 = jax.random.normal(k3, (B2, H2 * W2, C2), jnp.float32)
    w2 = jnp.ones((C2,), jnp.float32) + 0.1 * jax.random.normal(k4, (C2,), jnp.float32)
    out2 = jax.block_until_ready(biasfree_layernorm_pallas(x2, w2))
    ref2 = jax.block_until_ready(biasfree_layernorm_ref(x2, w2))
    np.testing.assert_allclose(np.asarray(out2), np.asarray(ref2), rtol=1e-4, atol=1e-4)

    # Case 3: bf16 input exercises the dtype-aware sublane (TR % 16) path.
    xb = x.astype(jnp.bfloat16)
    out3 = jax.block_until_ready(biasfree_layernorm_pallas(xb, w))
    ref3 = jax.block_until_ready(biasfree_layernorm_ref(xb, w))
    np.testing.assert_allclose(np.asarray(out3, dtype=np.float32),
                               np.asarray(ref3, dtype=np.float32),
                               rtol=2e-2, atol=2e-2)

    print("KERNEL_OK")
</pallas_src>

<mosaic_0001>
module attributes {stable_mosaic.version = 11 : i64} {
  func.func @kernel(%arg0: i32, %arg1: memref<128x128xf32, #tpu.memory_space<vmem>>, %arg2: memref<1x128xf32, #tpu.memory_space<vmem>>, %arg3: memref<128x128xf32, #tpu.memory_space<vmem>>) attributes {dimension_semantics = [#tpu.dimension_semantics<parallel>], iteration_bounds = array<i64: 4>, scalar_prefetch = 0 : i64, scratch_operands = 0 : i64, tpu.core_type = #tpu.core_type<tc>, window_params = [{transform_indices = @transform_0, window_bounds = array<i64: 128, 128>}, {pipeline_mode = #tpu.pipeline_mode<synchronous>, transform_indices = @transform_1, window_bounds = array<i64: 1, 128>}, {transform_indices = @transform_2, window_bounds = array<i64: 128, 128>}]} {
    %c0 = arith.constant 0 : index
    %c0_0 = arith.constant 0 : index
    %0 = vector.load %arg1[%c0, %c0_0] : memref<128x128xf32, #tpu.memory_space<vmem>>, vector<128x128xf32>
    %cst = arith.constant dense<0.000000e+00> : vector<128xf32>
    %1 = vector.multi_reduction <add>, %0, %cst [1] : vector<128x128xf32> to vector<128xf32>
    %2 = vector.shape_cast %1 : vector<128xf32> to vector<128x1xf32>
    %cst_1 = arith.constant 7.812500e-03 : f32
    %3 = vector.broadcast %cst_1 : f32 to vector<128x1xf32>
    %4 = arith.mulf %2, %3 : vector<128x1xf32>
    %5 = vector.broadcast %4 : vector<128x1xf32> to vector<128x128xf32>
    %6 = arith.subf %0, %5 : vector<128x128xf32>
    %7 = arith.mulf %6, %6 : vector<128x128xf32>
    %cst_2 = arith.constant dense<0.000000e+00> : vector<128xf32>
    %8 = vector.multi_reduction <add>, %7, %cst_2 [1] : vector<128x128xf32> to vector<128xf32>
    %9 = vector.shape_cast %8 : vector<128xf32> to vector<128x1xf32>
    %cst_3 = arith.constant 7.812500e-03 : f32
    %10 = vector.broadcast %cst_3 : f32 to vector<128x1xf32>
    %11 = arith.mulf %9, %10 : vector<128x1xf32>
    %cst_4 = arith.constant 9.99999974E-6 : f32
    %12 = vector.broadcast %cst_4 : f32 to vector<128x1xf32>
    %13 = arith.addf %11, %12 : vector<128x1xf32>
    %14 = math.rsqrt %13 : vector<128x1xf32>
    %15 = vector.broadcast %14 : vector<128x1xf32> to vector<128x128xf32>
    %16 = arith.mulf %0, %15 : vector<128x128xf32>
    %c0_5 = arith.constant 0 : index
    %c0_6 = arith.constant 0 : index
    %17 = vector.load %arg2[%c0_5, %c0_6] : memref<1x128xf32, #tpu.memory_space<vmem>>, vector<1x128xf32>
    %18 = vector.broadcast %17 : vector<1x128xf32> to vector<128x128xf32>
    %19 = arith.mulf %16, %18 : vector<128x128xf32>
    %c0_7 = arith.constant 0 : index
    %c0_8 = arith.constant 0 : index
    %20 = vector.load %arg3[%c0_7, %c0_8] : memref<128x128xf32, #tpu.memory_space<vmem>>, vector<128x128xf32>
    tpu.vector_store %arg3[%c0_7, %c0_8], %19 {strides = array<i32>} : memref<128x128xf32, #tpu.memory_space<vmem>>, vector<128x128xf32>,
    return
  }
  func.func @transform_0(%arg0: i32) -> (i32, i32) {
    %c0_i32 = arith.constant 0 : i32
    %c0_i32_0 = arith.constant 0 : i32
    return %arg0, %c0_i32 : i32, i32
  }
  func.func @transform_1(%arg0: i32) -> (i32, i32) {
    %c0_i32 = arith.constant 0 : i32
    %c0_i32_0 = arith.constant 0 : i32
    %c0_i32_1 = arith.constant 0 : i32
    return %c0_i32, %c0_i32_0 : i32, i32
  }
  func.func @transform_2(%arg0: i32) -> (i32, i32) {
    %c0_i32 = arith.constant 0 : i32
    %c0_i32_0 = arith.constant 0 : i32
    return %arg0, %c0_i32 : i32, i32
  }
}

</mosaic_0001>

<bundles_post_ra>
// kernel: tpu_custom_call.1
= control target key start
LH: loop header
LB: loop body
LE: loop exit
PB: predicated region body
PF: predicated region fallthrough
CT: control target
= control target key end

     0   :  { %7 = vsyncpa [#allocation3], 0  ;;  %s990_s0 = inlined_call_operand.hbm [shape: f32[512,128], index: 0, kind: input, shape index: {}]   ;;  %s991_s1 = inlined_call_operand.vmem [shape: f32[1,128], index: 1, kind: input, shape index: {}]   ;;  %s992_s2 = inlined_call_operand.hbm [shape: f32[512,128], index: 2, kind: output, shape index: {}]  }
   0x1   :  { %9 = vsyncpa [#allocation3 + $0x1], 0 }
   0x2   :  { %10 = vsyncpa [#allocation4], 0 }
   0x3   :  { %12 = vsyncpa [#allocation4 + $0x1], 0  ;;  %s696_s9 = smov 0   ;;  %s698_s10 = smov 0  }
   0x4   :  { %s700_s11 = smov 0   ;;  %s702_s12 = smov 0  }
   0x5 LB: > { %s717_s13 = sadd.s32 4294967295, %s673_s12   ;;  %s482_s14 = sadd.s32 4294967294, %s673_s12   ;;  %s673_s12 = sphi %s702_s12, %s1006_s12   ;;  %s669_s11 = sphi %s700_s11, %s1005_s11   ;;  %s665_s10 = sphi %s698_s10, %s1004_s10   ;;  %s661_s9 = sphi %s696_s9, %s1003_s9  }
   0x6   : > { %s721_s15 = sadd.s32 1, %s673_s12   ;;  %s25_s16 = sadd.s32 1, %s669_s11 }
   0x7   : > { %s22_s17 = ssub.s32 %s673_s12, %s721_s15  ;;  %p32_p0 = scmp.ne.s32.totalorder %s669_s11, %s665_s10 }
   0x8   : > { %p23_p1 = scmp.eq.s32.totalorder %s22_s17, 0  ;;  %p33_p2 = scmp.eq.s32.totalorder %s673_s12, 0 }
   0x9   : > { %p38_p3 = scmp.ne.s32.totalorder %s665_s10, %s661_s9  ;;  %p39_p4 = scmp.eq.s32.totalorder %s717_s13, 0 }
   0xa   : > { %s733_s18 = scalar_select %p23_p1, %s669_s11, %s25_s16  }
   0xb   : > { %p735_p5 = por %p33_p2, %p32_p0  ;;  %p739_p6 = por %p39_p4, %p38_p3 }
   0xc   : > { %p83_p7 = scmp.eq.s32.totalorder %s717_s13, 3  ;;  %p89_p8 = scmp.eq.s32.totalorder %s482_s14, 3 }
   0xd   : > { %s996_s20 = scalar_select %p739_p6, 1, 0 }
   0xe   : > { %p511_p9 = scmp.lt.s32.totalorder %s673_s12, 4  ;;  %p745_p10 = por %p83_p7, %p32_p0 }
   0xf   : > { %p749_p11 = por %p89_p8, %p38_p3  ;;  %s112_s23 = sand.u32 1, %s669_s11  }
  0x10   : > { %s997_s21 = scalar_select %p745_p10, 1, 0 }
  0x11   : > { %s998_s22 = scalar_select %p749_p11, 1, 0 }
  0x12   : > { %s497_s24 = sshll.u32 %s673_s12, 11  ;;  %s485_s25 = sshll.u32 %s112_s23, 7 }
  0x13   : > { %s758_s28 = scalar_lea.hbm %s990_s0, %s497_s24  ;;  %s116_s29 = scalar_lea.vmem [#allocation2], %s485_s25 }
  0x14   : > { %s123_s30 = sshll.u32 %s116_s29, 4  ;;  %p762_p12 = pnand %p511_p9, %p735_p5  ;;  %s766_s30 = int_to_ptr.vmem [resolvable:$true] %s123_s30 }
  0x15   : > { %s768_s4 = scalar_lea.sflag [#allocation3], %s112_s23  ;;  %s581_s5 = scalar_lea.hbm %s758_s28, 2048 }
  0x16   : > { %p582_p13 = scmp.ne.s32.totalorder %s758_s28, %s581_s5  ;;  %p583_p0 = pneg %p762_p12 }
  0x17   : > { %s586_s8 = scalar_lea.hbm %s990_s0, 8192  ;;  %p587_p3 = scmp.lt.s32.totalorder %s758_s28, %s990_s0 }
  0x18   : > { %p584_p1 = pnand %p583_p0, %p582_p13  ;;  %p588_p4 = scmp.lt.s32.totalorder %s586_s8, %s581_s5 }
  0x1a   : > { %p585_p2 = pneg %p584_p1  ;;  %p589_p5 = por %p588_p4, %p587_p3 }
  0x1c   : > { %p590_p7 = pnand %p589_p5, %p585_p2 }
  0x1e   : > { %593 = shalt.err (!%p590_p7)
}
  0x1f   : > { %s594_s17 = scalar_lea.vmem %s766_s30, 2048  ;;  %s675_s19 = smov [#allocation2]  }
  0x20   : > { %p595_p8 = scmp.ne.s32.totalorder %s766_s30, %s594_s17  ;;  %s599_s23 = sshll.u32 %s675_s19, 4  ;;  %s600_s23 = int_to_ptr.vmem [resolvable:$false] %s599_s23 }
  0x21   : > { %s601_s24 = scalar_lea.vmem %s600_s23, 4096  ;;  %p602_p1 = scmp.lt.s32.totalorder %s766_s30, %s600_s23 }
  0x22   : > { %p597_p9 = pnand %p595_p8, %p583_p0  ;;  %p603_p11 = scmp.lt.s32.totalorder %s601_s24, %s594_s17 }
  0x24   : > { %p598_p13 = pneg %p597_p9  ;;  %p604_p10 = por %p603_p11, %p602_p1 }
  0x26   : > { %p605_p6 = pnand %p604_p10, %p598_p13 }
  0x28   : > { %608 = shalt.err (!%p605_p6)
}
  0x29   : > { %s676_s25 = smov 128   ;;  %s677_s26 = smov 8  }
  0x2a   : > { %506 = dma.hbm_to_vmem [thread:$0]  (!%p762_p12), %s758_s28, 2048, %s766_s30, %s768_s4, %s676_s25, %s676_s25, %s677_s26  }
  0x2b   : > { %p488_p0 = scmp.ge.s32.totalorder %s673_s12, 1  ;;  %p131_p2 = scmp.lt.s32.totalorder %s673_s12, 5 }
  0x2d   : > { %p132_p3 = pnand %p488_p0, %p131_p2 }
  0x2e   : > { %s792_s27 = sand.u32 (!%p132_p3), 1, %s665_s10   ;;  %p1000_p6 = scmp.ne.s32.totalorder (!%p132_p3), %s996_s20, 0 }
  0x2f   : > { %135 = sbr.rel (%p132_p3) target bundleno = 404 (0x194), region = 28  ;;  %s489_s29 = sshll.u32 (!%p132_p3), %s792_s27, 7 }
  0x30   : > { %s138_s5 = scalar_lea.sflag (!%p132_p3), [#allocation3], %s792_s27  ;;  %s798_s6 = scalar_lea.vmem (!%p132_p3), [#allocation2], %s489_s29 }
  0x34   : > { %652 = dma.done.wait (%p1000_p6), %s138_s5, 2048  }
  0x35   : > { %654 = vsyncadd (%p1000_p6), %s138_s5, 4294965248  ;;  %v805_v0 = vld [vmem:[%s798_s6] sm:$0xff]  ;;  %v808_v1 = vld [vmem:[%s798_s6 + $0x10] sm:$0xff]  ;;  %s893_s30 = scalar_lea.vmem [#allocation5], %s489_s29  ;;  %s498_s3 = sshll.u32 %s717_s13, 11 }
  0x36   : > { %180 = vadd.xlane.f32.xlu0 %v805_v0  ;;  %184 = vadd.xlane.f32.xlu1 %v808_v1  ;;  %v813_v2 = vld [vmem:[%s798_s6 + $0x8] sm:$0xff]  ;;  %v816_v3 = vld [vmem:[%s798_s6 + $0x18] sm:$0xff]  ;;  %v824_v5 = vld [vmem:[%s798_s6 + $0x20] sm:$0xff]  ;;  %s409_s4 = sshll.u32 %s893_s30, 4  ;;  %s944_s14 = scalar_lea.hbm %s992_s2, %s498_s3  ;;  %s946_s4 = int_to_ptr.vmem [resolvable:$true] %s409_s4 }
  0x37   : > { %v821_v4 = vld [vmem:[%s798_s6 + $0x28] sm:$0xff]  ;;  %v829_v6 = vld [vmem:[%s798_s6 + $0x38] sm:$0xff]  ;;  %v832_v7 = vld [vmem:[%s798_s6 + $0x30] sm:$0xff]  ;;  %s396_s13 = scalar_lea.sflag [#allocation4], %s792_s27  ;;  %s609_s16 = scalar_lea.vmem %s946_s4, 2048 }
  0x38   : > { %v837_v8 = vld [vmem:[%s798_s6 + $0x48] sm:$0xff]  ;;  %v840_v9 = vld [vmem:[%s798_s6 + $0x40] sm:$0xff]  ;;  %v845_v10 = vld [vmem:[%s798_s6 + $0x58] sm:$0xff]  ;;  %p610_p10 = scmp.ne.s32.totalorder %s946_s4, %s609_s16  ;;  %p1001_p11 = scmp.ne.s32.totalorder %s997_s21, 0 }
  0x39   : > { %v848_v11 = vld [vmem:[%s798_s6 + $0x50] sm:$0xff]  ;;  %v853_v12 = vld [vmem:[%s798_s6 + $0x68] sm:$0xff]  ;;  %v856_v13 = vld [vmem:[%s798_s6 + $0x60] sm:$0xff]  ;;  %s678_s17 = smov [#allocation5]  }
  0x3a   : > { %182 = vadd.xlane.f32.xlu0 %v813_v2  ;;  %186 = vadd.xlane.f32.xlu1 %v816_v3  ;;  %v861_v14 = vld [vmem:[%s798_s6 + $0x78] sm:$0xff]  ;;  %v864_v15 = vld [vmem:[%s798_s6 + $0x70] sm:$0xff]  ;;  %p611_p12 = pnand %p610_p10, %p1001_p11  ;;  %s613_s19 = sshll.u32 %s678_s17, 4  ;;  %s614_s19 = int_to_ptr.vmem [resolvable:$false] %s613_s19 }
  0x3b   : > { %s615_s23 = scalar_lea.vmem %s614_s19, 4096  ;;  %p616_p5 = scmp.lt.s32.totalorder %s946_s4, %s614_s19 }
  0x3c   : > { %p612_p4 = pneg %p611_p12  ;;  %p617_p7 = scmp.lt.s32.totalorder %s615_s23, %s609_s16 }
  0x3e   : > { %190 = vadd.xlane.f32.xlu1 %v821_v4  ;;  %188 = vadd.xlane.f32.xlu0 %v824_v5  ;;  %p618_p8 = por %p617_p7, %p616_p5 }
  0x40   : > { %p619_p9 = pnand %p618_p8, %p612_p4 }
  0x42   : > { %194 = vadd.xlane.f32.xlu1 %v829_v6  ;;  %192 = vadd.xlane.f32.xlu0 %v832_v7 }
  0x46   : > { %198 = vadd.xlane.f32.xlu1 %v837_v8  ;;  %196 = vadd.xlane.f32.xlu0 %v840_v9 }
  0x4a   : > { %202 = vadd.xlane.f32.xlu1 %v845_v10  ;;  %200 = vadd.xlane.f32.xlu0 %v848_v11 }
  0x4e   : > { %206 = vadd.xlane.f32.xlu1 %v853_v12  ;;  %204 = vadd.xlane.f32.xlu0 %v856_v13 }
  0x52   : > { %210 = vadd.xlane.f32.xlu1 %v861_v14  ;;  %208 = vadd.xlane.f32.xlu0 %v864_v15 }
  0xbf   : > { %v181_v16 = vpop.xlane.xlu0 %180  ;;  %v185_v17 = vpop.xlane.xlu1 %184 }
  0xc0   : > { %v212_v18 = vmul.f32 0.0078125, %v181_v16  ;;  %v214_v19 = vmul.f32 0.0078125, %v185_v17 }
  0xc2   : > { %v228_v20 = vsub.f32 %v805_v0, %v212_v18  ;;  %v230_v21 = vsub.f32 %v808_v1, %v214_v19 }
  0xc3   : > { %v183_v22 = vpop.xlane.xlu0 %182  ;;  %v187_v23 = vpop.xlane.xlu1 %186 }
  0xc4   : > { %v213_v24 = vmul.f32 0.0078125, %v183_v22  ;;  %v244_v25 = vmul.f32 %v228_v20, %v228_v20  ;;  %v215_v26 = vmul.f32 0.0078125, %v187_v23  ;;  %v246_v27 = vmul.f32 %v230_v21, %v230_v21 }
  0xc6   : > { %260 = vadd.xlane.f32.xlu0 %v244_v25  ;;  %v229_v28 = vsub.f32 %v813_v2, %v213_v24  ;;  %v231_v29 = vsub.f32 %v816_v3, %v215_v26 }
  0xc7   : > { %v191_v30 = vpop.xlane.xlu1 %190  ;;  %v189_v31 = vpop.xlane.xlu0 %188 }
  0xc8   : > { %v245_v32 = vmul.f32 %v229_v28, %v229_v28  ;;  %v217_v33 = vmul.f32 0.0078125, %v191_v30  ;;  %v216_v34 = vmul.f32 0.0078125, %v189_v31  ;;  %v247_v35 = vmul.f32 %v231_v29, %v231_v29 }
  0xca   : > { %264 = vadd.xlane.f32.xlu0 %v246_v27  ;;  %262 = vadd.xlane.f32.xlu1 %v245_v32  ;;  %v233_v36 = vsub.f32 %v821_v4, %v217_v33  ;;  %v232_v37 = vsub.f32 %v824_v5, %v216_v34 }
  0xcb   : > { %v195_v38 = vpop.xlane.xlu1 %194  ;;  %v193_v39 = vpop.xlane.xlu0 %192 }
  0xcc   : > { %v219_v40 = vmul.f32 0.0078125, %v195_v38  ;;  %v218_v41 = vmul.f32 0.0078125, %v193_v39  ;;  %v248_v42 = vmul.f32 %v232_v37, %v232_v37  ;;  %v249_v43 = vmul.f32 %v233_v36, %v233_v36 }
  0xce   : > { %266 = vadd.xlane.f32.xlu1 %v247_v35  ;;  %268 = vadd.xlane.f32.xlu0 %v248_v42  ;;  %v235_v44 = vsub.f32 %v829_v6, %v219_v40  ;;  %v234_v45 = vsub.f32 %v832_v7, %v218_v41 }
  0xcf   : > { %v199_v46 = vpop.xlane.xlu1 %198  ;;  %v197_v47 = vpop.xlane.xlu0 %196 }
  0xd0   : > { %v221_v48 = vmul.f32 0.0078125, %v199_v46  ;;  %v220_v49 = vmul.f32 0.0078125, %v197_v47  ;;  %v250_v50 = vmul.f32 %v234_v45, %v234_v45  ;;  %v251_v51 = vmul.f32 %v235_v44, %v235_v44 }
  0xd2   : > { %270 = vadd.xlane.f32.xlu1 %v249_v43  ;;  %272 = vadd.xlane.f32.xlu0 %v250_v50  ;;  %v237_v52 = vsub.f32 %v837_v8, %v221_v48  ;;  %v236_v53 = vsub.f32 %v840_v9, %v220_v49 }
  0xd3   : > { %v203_v54 = vpop.xlane.xlu1 %202  ;;  %v201_v55 = vpop.xlane.xlu0 %200 }
  0xd4   : > { %v223_v56 = vmul.f32 0.0078125, %v203_v54  ;;  %v222_v57 = vmul.f32 0.0078125, %v201_v55  ;;  %v252_v58 = vmul.f32 %v236_v53, %v236_v53  ;;  %v253_v59 = vmul.f32 %v237_v52, %v237_v52 }
  0xd6   : > { %274 = vadd.xlane.f32.xlu1 %v251_v51  ;;  %276 = vadd.xlane.f32.xlu0 %v252_v58  ;;  %v239_v60 = vsub.f32 %v845_v10, %v223_v56  ;;  %v238_v61 = vsub.f32 %v848_v11, %v222_v57  ;;  %v887_v58 = vld [vmem:[%s991_s1] ss:$0 sm:$0xff] }
  0xd7   : > { %v207_v62 = vpop.xlane.xlu1 %206  ;;  %v205_v63 = vpop.xlane.xlu0 %204 }
  0xd8   : > { %v225_v16 = vmul.f32 0.0078125, %v207_v62  ;;  %v224_v17 = vmul.f32 0.0078125, %v205_v63  ;;  %v254_v18 = vmul.f32 %v238_v61, %v238_v61  ;;  %v255_v19 = vmul.f32 %v239_v60, %v239_v60 }
  0xda   : > { %278 = vadd.xlane.f32.xlu1 %v253_v59  ;;  %280 = vadd.xlane.f32.xlu0 %v254_v18  ;;  %v241_v20 = vsub.f32 %v853_v12, %v225_v16  ;;  %v240_v21 = vsub.f32 %v856_v13, %v224_v17 }
  0xdb   : > { %v211_v22 = vpop.xlane.xlu1 %210  ;;  %v209_v23 = vpop.xlane.xlu0 %208 }
  0xdc   : > { %v227_v24 = vmul.f32 0.0078125, %v211_v22  ;;  %v226_v25 = vmul.f32 0.0078125, %v209_v23  ;;  %v256_v26 = vmul.f32 %v240_v21, %v240_v21  ;;  %v257_v27 = vmul.f32 %v241_v20, %v241_v20 }
  0xde   : > { %282 = vadd.xlane.f32.xlu1 %v255_v19  ;;  %284 = vadd.xlane.f32.xlu0 %v256_v26  ;;  %v243_v28 = vsub.f32 %v861_v14, %v227_v24  ;;  %v242_v29 = vsub.f32 %v864_v15, %v226_v25 }
  0xe0   : > { %v258_v30 = vmul.f32 %v242_v29, %v242_v29  ;;  %v259_v31 = vmul.f32 %v243_v28, %v243_v28 }
  0xe2   : > { %286 = vadd.xlane.f32.xlu1 %v257_v27  ;;  %288 = vadd.xlane.f32.xlu0 %v258_v30 }
  0xe6   : > { %290 = vadd.xlane.f32.xlu1 %v259_v31 }
 0x14f   : > { %v261_v32 = vpop.xlane.xlu0 %260 }
 0x150   : > { %v292_v33 = vmul.f32 0.0078125, %v261_v32 }
 0x152   : > { %v308_v34 = vadd.f32 1e-05, %v292_v33 }
 0x153   : > { %v263_v35 = vpop.xlane.xlu1 %262  ;;  %v265_v36 = vpop.xlane.xlu0 %264 }
 0x154   : > { %549 = vrsqrt.f32 %v308_v34  ;;  %v293_v37 = vmul.f32 0.0078125, %v263_v35  ;;  %v294_v38 = vmul.f32 0.0078125, %v265_v36 }
 0x156   : > { %v309_v39 = vadd.f32 1e-05, %v293_v37  ;;  %v310_v40 = vadd.f32 1e-05, %v294_v38 }
 0x157   : > { %v267_v41 = vpop.xlane.xlu1 %266  ;;  %v269_v42 = vpop.xlane.xlu0 %268 }
 0x158   : > { %551 = vrsqrt.f32 %v309_v39  ;;  %v295_v43 = vmul.f32 0.0078125, %v267_v41  ;;  %v296_v44 = vmul.f32 0.0078125, %v269_v42 }
 0x159   : > { %553 = vrsqrt.f32 %v310_v40 }
 0x15a   : > { %v311_v45 = vadd.f32 1e-05, %v295_v43  ;;  %v312_v46 = vadd.f32 1e-05, %v296_v44 }
 0x15b   : > { %v271_v47 = vpop.xlane.xlu1 %270  ;;  %v273_v48 = vpop.xlane.xlu0 %272 }
 0x15c   : > { %555 = vrsqrt.f32 %v311_v45  ;;  %v297_v49 = vmul.f32 0.0078125, %v271_v47  ;;  %v298_v50 = vmul.f32 0.0078125, %v273_v48 }
 0x15d   : > { %557 = vrsqrt.f32 %v312_v46 }
 0x15e   : > { %v313_v51 = vadd.f32 1e-05, %v297_v49  ;;  %v314_v52 = vadd.f32 1e-05, %v298_v50 }
 0x15f   : > { %v275_v53 = vpop.xlane.xlu1 %274  ;;  %v277_v54 = vpop.xlane.xlu0 %276 }
 0x160   : > { %559 = vrsqrt.f32 %v313_v51  ;;  %v299_v55 = vmul.f32 0.0078125, %v275_v53  ;;  %v300_v56 = vmul.f32 0.0078125, %v277_v54 }
 0x161   : > { %v550_v57 = vpop.eup %549  ;;  %561 = vrsqrt.f32 %v314_v52 }
 0x162   : > { %v340_v59 = vmul.f32 %v550_v57, %v805_v0  ;;  %v315_v60 = vadd.f32 1e-05, %v299_v55  ;;  %v316_v61 = vadd.f32 1e-05, %v300_v56 }
 0x163   : > { %v279_v62 = vpop.xlane.xlu1 %278  ;;  %v281_v63 = vpop.xlane.xlu0 %280 }
 0x164   : > { %v363_v16 = vmul.f32 %v887_v58, %v340_v59  ;;  %563 = vrsqrt.f32 %v315_v60  ;;  %v301_v17 = vmul.f32 0.0078125, %v279_v62  ;;  %v302_v18 = vmul.f32 0.0078125, %v281_v63 }
 0x165   : > { %v552_v19 = vpop.eup %551  ;;  %565 = vrsqrt.f32 %v316_v61 }
 0x166   : > { %v554_v20 = vpop.eup %553  ;;  %379 = vst [vmem:[%s893_s30] sm:$0xff] %v363_v16  ;;  %v341_v0 = vmul.f32 %v552_v19, %v813_v2  ;;  %v317_v21 = vadd.f32 1e-05, %v301_v17  ;;  %v318_v22 = vadd.f32 1e-05, %v302_v18 }
 0x167   : > { %v342_v23 = vmul.f32 %v554_v20, %v808_v1  ;;  %v283_v24 = vpop.xlane.xlu1 %282  ;;  %v285_v25 = vpop.xlane.xlu0 %284 }
 0x168   : > { %v364_v26 = vmul.f32 %v887_v58, %v341_v0  ;;  %567 = vrsqrt.f32 %v317_v21  ;;  %v303_v27 = vmul.f32 0.0078125, %v283_v24  ;;  %v304_v28 = vmul.f32 0.0078125, %v285_v25 }
 0x169   : > { %v556_v29 = vpop.eup %555  ;;  %v365_v30 = vmul.f32 %v887_v58, %v342_v23  ;;  %569 = vrsqrt.f32 %v318_v22 }
 0x16a   : > { %v558_v31 = vpop.eup %557  ;;  %380 = vst [vmem:[%s893_s30 + $0x8] sm:$0xff] %v364_v26  ;;  %v343_v2 = vmul.f32 %v556_v29, %v816_v3  ;;  %v319_v32 = vadd.f32 1e-05, %v303_v27  ;;  %v320_v33 = vadd.f32 1e-05, %v304_v28 }
 0x16b   : > { %381 = vst [vmem:[%s893_s30 + $0x10] sm:$0xff] %v365_v30  ;;  %v344_v1 = vmul.f32 %v558_v31, %v824_v5  ;;  %v287_v34 = vpop.xlane.xlu1 %286  ;;  %v289_v35 = vpop.xlane.xlu0 %288 }
 0x16c   : > { %v366_v36 = vmul.f32 %v887_v58, %v343_v2  ;;  %571 = vrsqrt.f32 %v319_v32  ;;  %v305_v37 = vmul.f32 0.0078125, %v287_v34  ;;  %v306_v38 = vmul.f32 0.0078125, %v289_v35 }
 0x16d   : > { %v560_v39 = vpop.eup %559  ;;  %v367_v40 = vmul.f32 %v887_v58, %v344_v1  ;;  %573 = vrsqrt.f32 %v320_v33 }
 0x16e   : > { %v562_v41 = vpop.eup %561  ;;  %382 = vst [vmem:[%s893_s30 + $0x18] sm:$0xff] %v366_v36  ;;  %v345_v3 = vmul.f32 %v560_v39, %v821_v4  ;;  %v321_v42 = vadd.f32 1e-05, %v305_v37  ;;  %v322_v43 = vadd.f32 1e-05, %v306_v38 }
 0x16f   : > { %383 = vst [vmem:[%s893_s30 + $0x20] sm:$0xff] %v367_v40  ;;  %v346_v5 = vmul.f32 %v562_v41, %v832_v7  ;;  %v291_v44 = vpop.xlane.xlu1 %290 }
 0x170   : > { %v368_v45 = vmul.f32 %v887_v58, %v345_v3  ;;  %575 = vrsqrt.f32 %v321_v42  ;;  %v307_v46 = vmul.f32 0.0078125, %v291_v44 }
 0x171   : > { %v564_v47 = vpop.eup %563  ;;  %v369_v48 = vmul.f32 %v887_v58, %v346_v5  ;;  %577 = vrsqrt.f32 %v322_v43 }
 0x172   : > { %v566_v49 = vpop.eup %565  ;;  %384 = vst [vmem:[%s893_s30 + $0x28] sm:$0xff] %v368_v45  ;;  %v347_v4 = vmul.f32 %v564_v47, %v829_v6  ;;  %v323_v50 = vadd.f32 1e-05, %v307_v46 }
 0x173   : > { %385 = vst [vmem:[%s893_s30 + $0x30] sm:$0xff] %v369_v48  ;;  %v348_v7 = vmul.f32 %v566_v49, %v840_v9 }
 0x174   : > { %v370_v51 = vmul.f32 %v887_v58, %v347_v4  ;;  %579 = vrsqrt.f32 %v323_v50 }
 0x175   : > { %v568_v52 = vpop.eup %567  ;;  %v371_v53 = vmul.f32 %v887_v58, %v348_v7 }
 0x176   : > { %v570_v54 = vpop.eup %569  ;;  %386 = vst [vmem:[%s893_s30 + $0x38] sm:$0xff] %v370_v51  ;;  %v349_v55 = vmul.f32 %v568_v52, %v837_v8 }
 0x177   : > { %387 = vst [vmem:[%s893_s30 + $0x40] sm:$0xff] %v371_v53  ;;  %v350_v6 = vmul.f32 %v570_v54, %v848_v11 }
 0x178   : > { %v372_v56 = vmul.f32 %v887_v58, %v349_v55 }
 0x179   : > { %v572_v57 = vpop.eup %571  ;;  %v373_v9 = vmul.f32 %v887_v58, %v350_v6 }
 0x17a   : > { %v574_v59 = vpop.eup %573  ;;  %388 = vst [vmem:[%s893_s30 + $0x48] sm:$0xff] %v372_v56  ;;  %v351_v60 = vmul.f32 %v572_v57, %v845_v10 }
 0x17b   : > { %389 = vst [vmem:[%s893_s30 + $0x50] sm:$0xff] %v373_v9  ;;  %v352_v61 = vmul.f32 %v574_v59, %v856_v13 }
 0x17c   : > { %v374_v8 = vmul.f32 %v887_v58, %v351_v60 }
 0x17d   : > { %v576_v62 = vpop.eup %575  ;;  %v375_v11 = vmul.f32 %v887_v58, %v352_v61 }
 0x17e   : > { %v578_v63 = vpop.eup %577  ;;  %390 = vst [vmem:[%s893_s30 + $0x58] sm:$0xff] %v374_v8  ;;  %v353_v16 = vmul.f32 %v576_v62, %v853_v12 }
 0x17f   : > { %391 = vst [vmem:[%s893_s30 + $0x60] sm:$0xff] %v375_v11  ;;  %v354_v17 = vmul.f32 %v578_v63, %v864_v15 }
 0x180   : > { %v376_v10 = vmul.f32 %v887_v58, %v353_v16 }
 0x181   : > { %v580_v13 = vpop.eup %579  ;;  %v377_v18 = vmul.f32 %v887_v58, %v354_v17 }
 0x182   : > { %392 = vst [vmem:[%s893_s30 + $0x68] sm:$0xff] %v376_v10  ;;  %v355_v19 = vmul.f32 %v580_v13, %v861_v14 }
 0x183   : > { %393 = vst [vmem:[%s893_s30 + $0x70] sm:$0xff] %v377_v18 }
 0x184   : > { %v378_v12 = vmul.f32 %v887_v58, %v355_v19 }
 0x186   : > { %394 = vst [vmem:[%s893_s30 + $0x78] sm:$0xff] %v378_v12 }
 0x187   : > { %622 = shalt.err (!%p619_p9)
}
 0x188   : > { %s623_s24 = scalar_lea.hbm %s944_s14, 2048  ;;  %s627_s29 = scalar_lea.hbm %s992_s2, 8192 }
 0x189   : > { %p624_p13 = scmp.ne.s32.totalorder %s944_s14, %s623_s24  ;;  %p628_p2 = scmp.lt.s32.totalorder %s944_s14, %s992_s2 }
 0x18a   : > { %p629_p3 = scmp.lt.s32.totalorder %s627_s29, %s623_s24 }
 0x18b   : > { %p625_p1 = pnand %p624_p13, %p1001_p11 }
 0x18c   : > { %p630_p6 = por %p629_p3, %p628_p2 }
 0x18d   : > { %p626_p0 = pneg %p625_p1 }
 0x18f   : > { %p631_p10 = pnand %p630_p6, %p626_p0 }
 0x191   : > { %634 = shalt.err (!%p631_p10)
}
 0x192   : > { %s679_s20 = smov 128   ;;  %s680_s28 = smov 8  }
 0x193   : > { %501 = dma.vmem_to_hbm [thread:$0]  (%p1001_p11), %s946_s4, 2048, %s944_s14, %s396_s13, %s679_s20, %s679_s20, %s680_s28  }
 0x194 PF: > { %p512_p12 = scmp.ge.s32.totalorder %s673_s12, 2  ;;  %s424_s30 = sand.u32 1, %s661_s9  }
 0x195   : > { %p1002_p4 = scmp.ne.s32.totalorder %s998_s22, 0  ;;  %s425_s3 = scalar_lea.sflag [#allocation4], %s424_s30 }
 0x197   : > { %p508_p5 = pnand %p512_p12, %p1002_p4 }
 0x199   : > { %p509_p7 = pneg %p508_p5 }
 0x19b   : > { %656 = dma.done.wait (%p509_p7), %s425_s3, 2048  }
 0x19c   : > { %658 = vsyncadd (%p509_p7), %s425_s3, 4294965248  ;;  %p15_p8 = scmp.ge.s32.totalorder %s721_s15, 6   ;;  %s1003_s9 = smov %s665_s10 }
 0x19d   : > { %s1004_s10 = smov %s669_s11  ;;  %s1005_s11 = smov %s733_s18 }
 0x19e   : > { %s1006_s12 = smov %s721_s15  ;;  %17 = sbr.rel (!%p15_p8) target bundleno = 5 (0x5), region = 73 }
 0x1a3   :  { %430 = vsyncpa [#allocation3], 1 }
 0x1a4   :  { %432 = vsyncpa [#allocation3 + $0x1], 1 }
 0x1a5   :  { %433 = vsyncpa [#allocation4], 1 }
 0x1a6   :  { %435 = vsyncpa [#allocation4 + $0x1], 1 }

</bundles_post_ra>
